<compile_context>
chip_gen: v7x
topology: tpu7x:2x2x1
jax: 0.10.0
libtpu: 0.0.40
codegen_flags: <defaults>
</compile_context>

<pallas_src>
import jax
import jax.numpy as jnp
from jax import lax
from jax.experimental import pallas as pl
from jax.experimental.pallas import tpu as pltpu


# ---------------------------------------------------------------------------
# Pallas kernel: one batch element per grid step, heads looped one at a time
# ---------------------------------------------------------------------------
def _make_attention_kernel(num_heads: int, dim: int):
    d = dim // num_heads
    c = dim

    def kernel(x_ref, wqkv_ref, wp_ref, bp_ref, o_ref,
               q_scr, k_scr, v_scr, o_scr):
        # x_ref    : (1, N, C)  bf16   current batch element
        # wqkv_ref : (C, 3C)    bf16   [Wq^T * scale | Wk^T | Wv^T]
        # wp_ref   : (C, C)     bf16   Wproj^T
        # bp_ref   : (1, C)     f32    proj bias
        # o_ref    : (1, N, C)  out dtype
        # q/k/v/o_scr : (H, N, D) bf16 per-head scratch
        x = x_ref[0]                                             # (N, C) bf16

        # Fused q/kv projection: single bf16 MXU matmul, f32 accumulation.
        # q columns are pre-scaled by the softmax scale (folded into the weight).
        qkv = jnp.dot(x, wqkv_ref[...],
                      preferred_element_type=jnp.float32)        # (N, 3C) f32

        # Scatter per-head slices into (H, N, D) scratch (static slices).
        for hh in range(num_heads):
            q_scr[hh] = qkv[:, hh * d:(hh + 1) * d].astype(jnp.bfloat16)
            k_scr[hh] = qkv[:, c + hh * d:c + (hh + 1) * d].astype(jnp.bfloat16)
            v_scr[hh] = qkv[:, 2 * c + hh * d:2 * c + (hh + 1) * d].astype(jnp.bfloat16)

        # One head per iteration -> only a single (N, N) score matrix live at a time.
        def head_body(h, carry):
            qh = q_scr[h]                                        # (N, D) bf16, pre-scaled
            kh = k_scr[h]                                        # (N, D) bf16
            vh = v_scr[h]                                        # (N, D) bf16
            s = lax.dot_general(qh, kh, (((1,), (1,)), ((), ())),
                                preferred_element_type=jnp.float32)   # (N, N) f32
            # numerically-stable, *unnormalized* softmax (f32 elementwise for v5e)
            m = jnp.max(s, axis=-1, keepdims=True)
            p = jnp.exp(s - m)                                   # (N, N) f32
            r = jnp.sum(p, axis=-1, keepdims=True)               # (N, 1) f32
            oh = jnp.dot(p.astype(jnp.bfloat16), vh,
                         preferred_element_type=jnp.float32)     # (N, D) f32
            # deferred normalization: multiply the small (N, D) result, EUP reciprocal
            oh = oh * pl.reciprocal(r, approx=True)
            o_scr[h] = oh.astype(jnp.bfloat16)
            return carry

        lax.fori_loop(0, num_heads, head_body, 0)

        # Gather heads into a lane-dense (N, C) slab, then one full-width projection.
        o = jnp.concatenate([o_scr[hh] for hh in range(num_heads)], axis=-1)  # (N, C) bf16
        y = jnp.dot(o, wp_ref[...], preferred_element_type=jnp.float32) + bp_ref[...]
        o_ref[0] = y.astype(o_ref.dtype)

    return kernel


# ---------------------------------------------------------------------------
# wrapper
# ---------------------------------------------------------------------------
def attention_forward(x, wq, wkv, wproj, bproj, *, num_heads: int, qk_scale=None):
    """x: (B, N, C); wq: (C, C); wkv: (2C, C); wproj: (C, C); bproj: (C,).
    Equivalent to Attention.forward(x, H, W) with sr_ratio=1 (H, W unused)."""
    b, n, c = x.shape
    assert c % num_heads == 0
    head_dim = c // num_heads
    scale = float(qk_scale) if qk_scale is not None else head_dim ** (-0.5)

    # Parameter prep (glue; in a real model do this once at weight-load time):
    #  * fold the softmax scale into Wq
    #  * fuse q and kv weights into one (C, 3C) matrix
    #  * pre-transpose so the kernel does plain (N,C)@(C,*) matmuls
    #  * cast matmul operands to bf16 (halves DMA bytes + VMEM, bf16-native MXU)
    # TODO(synk): hoist this prep out of the per-call path in a full model.
    wqkv_t = jnp.concatenate([wq.T * scale, wkv.T], axis=-1).astype(jnp.bfloat16)  # (C, 3C)
    wproj_t = wproj.T.astype(jnp.bfloat16)                                         # (C, C)
    bproj2 = bproj.reshape(1, c).astype(jnp.float32)                               # (1, C)
    x_bf16 = x.astype(jnp.bfloat16)

    kernel = _make_attention_kernel(num_heads, c)

    return pl.pallas_call(
        kernel,
        out_shape=jax.ShapeDtypeStruct((b, n, c), x.dtype),
        grid_spec=pltpu.PrefetchScalarGridSpec(
            num_scalar_prefetch=0,
            grid=(b,),
            in_specs=[
                pl.BlockSpec((1, n, c), lambda i: (i, 0, 0)),      # x (per batch)
                pl.BlockSpec((c, 3 * c), lambda i: (0, 0)),        # [Wq^T*scale|Wkv^T]
                pl.BlockSpec((c, c), lambda i: (0, 0)),            # Wproj^T
                pl.BlockSpec((1, c), lambda i: (0, 0)),            # b_proj
            ],
            out_specs=pl.BlockSpec((1, n, c), lambda i: (i, 0, 0)),
            scratch_shapes=[
                pltpu.VMEM((num_heads, n, head_dim), jnp.bfloat16),  # q per head
                pltpu.VMEM((num_heads, n, head_dim), jnp.bfloat16),  # k per head
                pltpu.VMEM((num_heads, n, head_dim), jnp.bfloat16),  # v per head
                pltpu.VMEM((num_heads, n, head_dim), jnp.bfloat16),  # o per head
            ],
        ),
        compiler_params=pltpu.CompilerParams(
            dimension_semantics=("parallel",),
            vmem_limit_bytes=32 * 1024 * 1024,
        ),
    )(x_bf16, wqkv_t, wproj_t, bproj2)


# ---------------------------------------------------------------------------
# demo / self-check
# ---------------------------------------------------------------------------
if __name__ == "__main__":
    # small shapes implied by the module: B=2, seq N=16 (H=W=4), dim C=32, 4 heads
    B, N, C = 2, 16, 32
    NUM_HEADS = 4
    HEAD_DIM = C // NUM_HEADS
    H = W = 4  # N == H * W; unused when sr_ratio == 1

    key = jax.random.PRNGKey(0)
    kx, kq, kkv, kp, kb = jax.random.split(key, 5)
    x = jax.random.normal(kx, (B, N, C), dtype=jnp.float32)

    # PyTorch nn.Linear-style init: U(-1/sqrt(fan_in), 1/sqrt(fan_in)), fan_in = C
    bound = 1.0 / (C ** 0.5)
    wq = jax.random.uniform(kq, (C, C), minval=-bound, maxval=bound, dtype=jnp.float32)
    wkv = jax.random.uniform(kkv, (2 * C, C), minval=-bound, maxval=bound, dtype=jnp.float32)
    wproj = jax.random.uniform(kp, (C, C), minval=-bound, maxval=bound, dtype=jnp.float32)
    bproj = jax.random.uniform(kb, (C,), minval=-bound, maxval=bound, dtype=jnp.float32)

    out = attention_forward(x, wq, wkv, wproj, bproj, num_heads=NUM_HEADS)
    out = jax.block_until_ready(out)

    # pure-JAX f32 reference replicating the PyTorch forward (sr_ratio=1, eval mode)
    scale = HEAD_DIM ** (-0.5)
    q = (x @ wq.T).reshape(B, N, NUM_HEADS, HEAD_DIM).transpose(0, 2, 1, 3)
    kv = (x @ wkv.T).reshape(B, N, 2, NUM_HEADS, HEAD_DIM).transpose(2, 0, 3, 1, 4)
    k_ref, v_ref = kv[0], kv[1]
    attn = jax.nn.softmax((q @ jnp.swapaxes(k_ref, -2, -1)) * scale, axis=-1)
    ref = (attn @ v_ref).transpose(0, 2, 1, 3).reshape(B, N, C) @ wproj.T + bproj

    assert out.shape == (B, N, C)
    # bf16 MXU operands + approx reciprocal -> looser tolerance vs the f32 reference
    err = float(jnp.max(jnp.abs(out - ref)))
    assert jnp.allclose(out, ref, atol=5e-2, rtol=5e-2), err
    print("KERNEL_OK")
</pallas_src>

<mosaic_0001>
module attributes {stable_mosaic.version = 11 : i64} {
  func.func @kernel(%arg0: i32, %arg1: memref<1x16x32xbf16, #tpu.memory_space<vmem>>, %arg2: memref<32x96xbf16, #tpu.memory_space<vmem>>, %arg3: memref<32x32xbf16, #tpu.memory_space<vmem>>, %arg4: memref<1x32xf32, #tpu.memory_space<vmem>>, %arg5: memref<1x16x32xf32, #tpu.memory_space<vmem>>, %arg6: memref<4x16x8xbf16, #tpu.memory_space<vmem>>, %arg7: memref<4x16x8xbf16, #tpu.memory_space<vmem>>, %arg8: memref<4x16x8xbf16, #tpu.memory_space<vmem>>, %arg9: memref<4x16x8xbf16, #tpu.memory_space<vmem>>) attributes {dimension_semantics = [#tpu.dimension_semantics<parallel>], iteration_bounds = array<i64: 2>, scalar_prefetch = 0 : i64, scratch_operands = 4 : i64, tpu.core_type = #tpu.core_type<tc>, window_params = [{transform_indices = @transform_0, window_bounds = array<i64: 1, 16, 32>}, {pipeline_mode = #tpu.pipeline_mode<synchronous>, transform_indices = @transform_1, window_bounds = array<i64: 32, 96>}, {pipeline_mode = #tpu.pipeline_mode<synchronous>, transform_indices = @transform_2, window_bounds = array<i64: 32, 32>}, {pipeline_mode = #tpu.pipeline_mode<synchronous>, transform_indices = @transform_3, window_bounds = array<i64: 1, 32>}, {transform_indices = @transform_4, window_bounds = array<i64: 1, 16, 32>}]} {
    %c0 = arith.constant 0 : index
    %c0_0 = arith.constant 0 : index
    %c0_1 = arith.constant 0 : index
    %0 = vector.load %arg1[%c0, %c0_0, %c0_1] : memref<1x16x32xbf16, #tpu.memory_space<vmem>>, vector<1x16x32xbf16>
    %1 = vector.shape_cast %0 : vector<1x16x32xbf16> to vector<16x32xbf16>
    %c0_2 = arith.constant 0 : index
    %c0_3 = arith.constant 0 : index
    %2 = vector.load %arg2[%c0_2, %c0_3] : memref<32x96xbf16, #tpu.memory_space<vmem>>, vector<32x96xbf16>
    %cst = arith.constant dense<0.000000e+00> : vector<16x96xf32>
    %3 = tpu.matmul %1, %2, %cst {dimension_numbers = #tpu.dot_dimension_numbers<[1], [0], [0], [1], [0, 0, 1, 1], [], []>} : vector<16x32xbf16>, vector<32x96xbf16>, vector<16x96xf32> -> vector<16x96xf32>
    %4 = vector.extract_strided_slice %3 {offsets = [0, 0], sizes = [16, 8], strides = [1, 1]} : vector<16x96xf32> to vector<16x8xf32>
    %5 = arith.truncf %4 : vector<16x8xf32> to vector<16x8xbf16>
    %c0_4 = arith.constant 0 : index
    %c0_5 = arith.constant 0 : index
    %c0_6 = arith.constant 0 : index
    %6 = vector.load %arg6[%c0_4, %c0_5, %c0_6] : memref<4x16x8xbf16, #tpu.memory_space<vmem>>, vector<1x16x8xbf16>
    %7 = vector.shape_cast %6 : vector<1x16x8xbf16> to vector<16x8xbf16>
    %8 = vector.shape_cast %5 : vector<16x8xbf16> to vector<1x16x8xbf16>
    tpu.vector_store %arg6[%c0_4, %c0_5, %c0_6], %8 {strides = array<i32>} : memref<4x16x8xbf16, #tpu.memory_space<vmem>>, vector<1x16x8xbf16>,
    %9 = vector.extract_strided_slice %3 {offsets = [0, 32], sizes = [16, 8], strides = [1, 1]} : vector<16x96xf32> to vector<16x8xf32>
    %10 = arith.truncf %9 : vector<16x8xf32> to vector<16x8xbf16>
    %c0_7 = arith.constant 0 : index
    %c0_8 = arith.constant 0 : index
    %c0_9 = arith.constant 0 : index
    %11 = vector.load %arg7[%c0_7, %c0_8, %c0_9] : memref<4x16x8xbf16, #tpu.memory_space<vmem>>, vector<1x16x8xbf16>
    %12 = vector.shape_cast %11 : vector<1x16x8xbf16> to vector<16x8xbf16>
    %13 = vector.shape_cast %10 : vector<16x8xbf16> to vector<1x16x8xbf16>
    tpu.vector_store %arg7[%c0_7, %c0_8, %c0_9], %13 {strides = array<i32>} : memref<4x16x8xbf16, #tpu.memory_space<vmem>>, vector<1x16x8xbf16>,
    %14 = vector.extract_strided_slice %3 {offsets = [0, 64], sizes = [16, 8], strides = [1, 1]} : vector<16x96xf32> to vector<16x8xf32>
    %15 = arith.truncf %14 : vector<16x8xf32> to vector<16x8xbf16>
    %c0_10 = arith.constant 0 : index
    %c0_11 = arith.constant 0 : index
    %c0_12 = arith.constant 0 : index
    %16 = vector.load %arg8[%c0_10, %c0_11, %c0_12] : memref<4x16x8xbf16, #tpu.memory_space<vmem>>, vector<1x16x8xbf16>
    %17 = vector.shape_cast %16 : vector<1x16x8xbf16> to vector<16x8xbf16>
    %18 = vector.shape_cast %15 : vector<16x8xbf16> to vector<1x16x8xbf16>
    tpu.vector_store %arg8[%c0_10, %c0_11, %c0_12], %18 {strides = array<i32>} : memref<4x16x8xbf16, #tpu.memory_space<vmem>>, vector<1x16x8xbf16>,
    %19 = vector.extract_strided_slice %3 {offsets = [0, 8], sizes = [16, 8], strides = [1, 1]} : vector<16x96xf32> to vector<16x8xf32>
    %20 = arith.truncf %19 : vector<16x8xf32> to vector<16x8xbf16>
    %c1 = arith.constant 1 : index
    %c0_13 = arith.constant 0 : index
    %c0_14 = arith.constant 0 : index
    %21 = vector.load %arg6[%c1, %c0_13, %c0_14] : memref<4x16x8xbf16, #tpu.memory_space<vmem>>, vector<1x16x8xbf16>
    %22 = vector.shape_cast %21 : vector<1x16x8xbf16> to vector<16x8xbf16>
    %23 = vector.shape_cast %20 : vector<16x8xbf16> to vector<1x16x8xbf16>
    tpu.vector_store %arg6[%c1, %c0_13, %c0_14], %23 {strides = array<i32>} : memref<4x16x8xbf16, #tpu.memory_space<vmem>>, vector<1x16x8xbf16>,
    %24 = vector.extract_strided_slice %3 {offsets = [0, 40], sizes = [16, 8], strides = [1, 1]} : vector<16x96xf32> to vector<16x8xf32>
    %25 = arith.truncf %24 : vector<16x8xf32> to vector<16x8xbf16>
    %c1_15 = arith.constant 1 : index
    %c0_16 = arith.constant 0 : index
    %c0_17 = arith.constant 0 : index
    %26 = vector.load %arg7[%c1_15, %c0_16, %c0_17] : memref<4x16x8xbf16, #tpu.memory_space<vmem>>, vector<1x16x8xbf16>
    %27 = vector.shape_cast %26 : vector<1x16x8xbf16> to vector<16x8xbf16>
    %28 = vector.shape_cast %25 : vector<16x8xbf16> to vector<1x16x8xbf16>
    tpu.vector_store %arg7[%c1_15, %c0_16, %c0_17], %28 {strides = array<i32>} : memref<4x16x8xbf16, #tpu.memory_space<vmem>>, vector<1x16x8xbf16>,
    %29 = vector.extract_strided_slice %3 {offsets = [0, 72], sizes = [16, 8], strides = [1, 1]} : vector<16x96xf32> to vector<16x8xf32>
    %30 = arith.truncf %29 : vector<16x8xf32> to vector<16x8xbf16>
    %c1_18 = arith.constant 1 : index
    %c0_19 = arith.constant 0 : index
    %c0_20 = arith.constant 0 : index
    %31 = vector.load %arg8[%c1_18, %c0_19, %c0_20] : memref<4x16x8xbf16, #tpu.memory_space<vmem>>, vector<1x16x8xbf16>
    %32 = vector.shape_cast %31 : vector<1x16x8xbf16> to vector<16x8xbf16>
    %33 = vector.shape_cast %30 : vector<16x8xbf16> to vector<1x16x8xbf16>
    tpu.vector_store %arg8[%c1_18, %c0_19, %c0_20], %33 {strides = array<i32>} : memref<4x16x8xbf16, #tpu.memory_space<vmem>>, vector<1x16x8xbf16>,
    %34 = vector.extract_strided_slice %3 {offsets = [0, 16], sizes = [16, 8], strides = [1, 1]} : vector<16x96xf32> to vector<16x8xf32>
    %35 = arith.truncf %34 : vector<16x8xf32> to vector<16x8xbf16>
    %c2 = arith.constant 2 : index
    %c0_21 = arith.constant 0 : index
    %c0_22 = arith.constant 0 : index
    %36 = vector.load %arg6[%c2, %c0_21, %c0_22] : memref<4x16x8xbf16, #tpu.memory_space<vmem>>, vector<1x16x8xbf16>
    %37 = vector.shape_cast %36 : vector<1x16x8xbf16> to vector<16x8xbf16>
    %38 = vector.shape_cast %35 : vector<16x8xbf16> to vector<1x16x8xbf16>
    tpu.vector_store %arg6[%c2, %c0_21, %c0_22], %38 {strides = array<i32>} : memref<4x16x8xbf16, #tpu.memory_space<vmem>>, vector<1x16x8xbf16>,
    %39 = vector.extract_strided_slice %3 {offsets = [0, 48], sizes = [16, 8], strides = [1, 1]} : vector<16x96xf32> to vector<16x8xf32>
    %40 = arith.truncf %39 : vector<16x8xf32> to vector<16x8xbf16>
    %c2_23 = arith.constant 2 : index
    %c0_24 = arith.constant 0 : index
    %c0_25 = arith.constant 0 : index
    %41 = vector.load %arg7[%c2_23, %c0_24, %c0_25] : memref<4x16x8xbf16, #tpu.memory_space<vmem>>, vector<1x16x8xbf16>
    %42 = vector.shape_cast %41 : vector<1x16x8xbf16> to vector<16x8xbf16>
    %43 = vector.shape_cast %40 : vector<16x8xbf16> to vector<1x16x8xbf16>
    tpu.vector_store %arg7[%c2_23, %c0_24, %c0_25], %43 {strides = array<i32>} : memref<4x16x8xbf16, #tpu.memory_space<vmem>>, vector<1x16x8xbf16>,
    %44 = vector.extract_strided_slice %3 {offsets = [0, 80], sizes = [16, 8], strides = [1, 1]} : vector<16x96xf32> to vector<16x8xf32>
    %45 = arith.truncf %44 : vector<16x8xf32> to vector<16x8xbf16>
    %c2_26 = arith.constant 2 : index
    %c0_27 = arith.constant 0 : index
    %c0_28 = arith.constant 0 : index
    %46 = vector.load %arg8[%c2_26, %c0_27, %c0_28] : memref<4x16x8xbf16, #tpu.memory_space<vmem>>, vector<1x16x8xbf16>
    %47 = vector.shape_cast %46 : vector<1x16x8xbf16> to vector<16x8xbf16>
    %48 = vector.shape_cast %45 : vector<16x8xbf16> to vector<1x16x8xbf16>
    tpu.vector_store %arg8[%c2_26, %c0_27, %c0_28], %48 {strides = array<i32>} : memref<4x16x8xbf16, #tpu.memory_space<vmem>>, vector<1x16x8xbf16>,
    %49 = vector.extract_strided_slice %3 {offsets = [0, 24], sizes = [16, 8], strides = [1, 1]} : vector<16x96xf32> to vector<16x8xf32>
    %50 = arith.truncf %49 : vector<16x8xf32> to vector<16x8xbf16>
    %c3 = arith.constant 3 : index
    %c0_29 = arith.constant 0 : index
    %c0_30 = arith.constant 0 : index
    %51 = vector.load %arg6[%c3, %c0_29, %c0_30] : memref<4x16x8xbf16, #tpu.memory_space<vmem>>, vector<1x16x8xbf16>
    %52 = vector.shape_cast %51 : vector<1x16x8xbf16> to vector<16x8xbf16>
    %53 = vector.shape_cast %50 : vector<16x8xbf16> to vector<1x16x8xbf16>
    tpu.vector_store %arg6[%c3, %c0_29, %c0_30], %53 {strides = array<i32>} : memref<4x16x8xbf16, #tpu.memory_space<vmem>>, vector<1x16x8xbf16>,
    %54 = vector.extract_strided_slice %3 {offsets = [0, 56], sizes = [16, 8], strides = [1, 1]} : vector<16x96xf32> to vector<16x8xf32>
    %55 = arith.truncf %54 : vector<16x8xf32> to vector<16x8xbf16>
    %c3_31 = arith.constant 3 : index
    %c0_32 = arith.constant 0 : index
    %c0_33 = arith.constant 0 : index
    %56 = vector.load %arg7[%c3_31, %c0_32, %c0_33] : memref<4x16x8xbf16, #tpu.memory_space<vmem>>, vector<1x16x8xbf16>
    %57 = vector.shape_cast %56 : vector<1x16x8xbf16> to vector<16x8xbf16>
    %58 = vector.shape_cast %55 : vector<16x8xbf16> to vector<1x16x8xbf16>
    tpu.vector_store %arg7[%c3_31, %c0_32, %c0_33], %58 {strides = array<i32>} : memref<4x16x8xbf16, #tpu.memory_space<vmem>>, vector<1x16x8xbf16>,
    %59 = vector.extract_strided_slice %3 {offsets = [0, 88], sizes = [16, 8], strides = [1, 1]} : vector<16x96xf32> to vector<16x8xf32>
    %60 = arith.truncf %59 : vector<16x8xf32> to vector<16x8xbf16>
    %c3_34 = arith.constant 3 : index
    %c0_35 = arith.constant 0 : index
    %c0_36 = arith.constant 0 : index
    %61 = vector.load %arg8[%c3_34, %c0_35, %c0_36] : memref<4x16x8xbf16, #tpu.memory_space<vmem>>, vector<1x16x8xbf16>
    %62 = vector.shape_cast %61 : vector<1x16x8xbf16> to vector<16x8xbf16>
    %63 = vector.shape_cast %60 : vector<16x8xbf16> to vector<1x16x8xbf16>
    tpu.vector_store %arg8[%c3_34, %c0_35, %c0_36], %63 {strides = array<i32>} : memref<4x16x8xbf16, #tpu.memory_space<vmem>>, vector<1x16x8xbf16>,
    %c0_i32 = arith.constant 0 : i32
    %c4_i32 = arith.constant 4 : i32
    %64 = arith.addi %c0_i32, %c4_i32 : i32
    %c1_i32 = arith.constant 1 : i32
    scf.for %arg10 = %c0_i32 to %64 step %c1_i32  : i32 {
      %82 = arith.index_cast %arg10 : i32 to index
      %c0_58 = arith.constant 0 : index
      %c0_59 = arith.constant 0 : index
      %83 = vector.load %arg6[%82, %c0_58, %c0_59] : memref<4x16x8xbf16, #tpu.memory_space<vmem>>, vector<1x16x8xbf16>
      %84 = vector.shape_cast %83 : vector<1x16x8xbf16> to vector<16x8xbf16>
      %85 = arith.index_cast %arg10 : i32 to index
      %c0_60 = arith.constant 0 : index
      %c0_61 = arith.constant 0 : index
      %86 = vector.load %arg7[%85, %c0_60, %c0_61] : memref<4x16x8xbf16, #tpu.memory_space<vmem>>, vector<1x16x8xbf16>
      %87 = vector.shape_cast %86 : vector<1x16x8xbf16> to vector<16x8xbf16>
      %88 = arith.index_cast %arg10 : i32 to index
      %c0_62 = arith.constant 0 : index
      %c0_63 = arith.constant 0 : index
      %89 = vector.load %arg8[%88, %c0_62, %c0_63] : memref<4x16x8xbf16, #tpu.memory_space<vmem>>, vector<1x16x8xbf16>
      %90 = vector.shape_cast %89 : vector<1x16x8xbf16> to vector<16x8xbf16>
      %cst_64 = arith.constant dense<0.000000e+00> : vector<16x16xf32>
      %91 = tpu.matmul %84, %87, %cst_64 {dimension_numbers = #tpu.dot_dimension_numbers<[1], [1], [0], [0], [0, 0, 1, 0], [], []>} : vector<16x8xbf16>, vector<16x8xbf16>, vector<16x16xf32> -> vector<16x16xf32>
      %cst_65 = arith.constant dense<0xFF800000> : vector<16xf32>
      %92 = vector.multi_reduction <maximumf>, %91, %cst_65 [1] : vector<16x16xf32> to vector<16xf32>
      %93 = vector.shape_cast %92 : vector<16xf32> to vector<16x1xf32>
      %94 = vector.broadcast %93 : vector<16x1xf32> to vector<16x16xf32>
      %95 = arith.subf %91, %94 : vector<16x16xf32>
      %96 = math.exp %95 : vector<16x16xf32>
      %cst_66 = arith.constant dense<0.000000e+00> : vector<16xf32>
      %97 = vector.multi_reduction <add>, %96, %cst_66 [1] : vector<16x16xf32> to vector<16xf32>
      %98 = vector.shape_cast %97 : vector<16xf32> to vector<16x1xf32>
      %99 = arith.truncf %96 : vector<16x16xf32> to vector<16x16xbf16>
      %cst_67 = arith.constant dense<0.000000e+00> : vector<16x8xf32>
      %100 = tpu.matmul %99, %90, %cst_67 {dimension_numbers = #tpu.dot_dimension_numbers<[1], [0], [0], [1], [0, 0, 1, 1], [], []>} : vector<16x16xbf16>, vector<16x8xbf16>, vector<16x8xf32> -> vector<16x8xf32>
      %101 = tpu.reciprocal %98 {approx = true} : vector<16x1xf32> -> vector<16x1xf32>
      %102 = vector.broadcast %101 : vector<16x1xf32> to vector<16x8xf32>
      %103 = arith.mulf %100, %102 : vector<16x8xf32>
      %104 = arith.truncf %103 : vector<16x8xf32> to vector<16x8xbf16>
      %105 = arith.index_cast %arg10 : i32 to index
      %c0_68 = arith.constant 0 : index
      %c0_69 = arith.constant 0 : index
      %106 = vector.load %arg9[%105, %c0_68, %c0_69] : memref<4x16x8xbf16, #tpu.memory_space<vmem>>, vector<1x16x8xbf16>
      %107 = vector.shape_cast %106 : vector<1x16x8xbf16> to vector<16x8xbf16>
      %108 = vector.shape_cast %104 : vector<16x8xbf16> to vector<1x16x8xbf16>
      tpu.vector_store %arg9[%105, %c0_68, %c0_69], %108 {strides = array<i32>} : memref<4x16x8xbf16, #tpu.memory_space<vmem>>, vector<1x16x8xbf16>,
    }
    %c4_i32_37 = arith.constant 4 : i32
    %c0_38 = arith.constant 0 : index
    %c0_39 = arith.constant 0 : index
    %c0_40 = arith.constant 0 : index
    %65 = vector.load %arg9[%c0_38, %c0_39, %c0_40] : memref<4x16x8xbf16, #tpu.memory_space<vmem>>, vector<1x16x8xbf16>
    %66 = vector.shape_cast %65 : vector<1x16x8xbf16> to vector<16x8xbf16>
    %c1_41 = arith.constant 1 : index
    %c0_42 = arith.constant 0 : index
    %c0_43 = arith.constant 0 : index
    %67 = vector.load %arg9[%c1_41, %c0_42, %c0_43] : memref<4x16x8xbf16, #tpu.memory_space<vmem>>, vector<1x16x8xbf16>
    %68 = vector.shape_cast %67 : vector<1x16x8xbf16> to vector<16x8xbf16>
    %c2_44 = arith.constant 2 : index
    %c0_45 = arith.constant 0 : index
    %c0_46 = arith.constant 0 : index
    %69 = vector.load %arg9[%c2_44, %c0_45, %c0_46] : memref<4x16x8xbf16, #tpu.memory_space<vmem>>, vector<1x16x8xbf16>
    %70 = vector.shape_cast %69 : vector<1x16x8xbf16> to vector<16x8xbf16>
    %c3_47 = arith.constant 3 : index
    %c0_48 = arith.constant 0 : index
    %c0_49 = arith.constant 0 : index
    %71 = vector.load %arg9[%c3_47, %c0_48, %c0_49] : memref<4x16x8xbf16, #tpu.memory_space<vmem>>, vector<1x16x8xbf16>
    %72 = vector.shape_cast %71 : vector<1x16x8xbf16> to vector<16x8xbf16>
    %73 = tpu.concatenate %66, %68, %70, %72 in 1 : vector<16x8xbf16>, vector<16x8xbf16>, vector<16x8xbf16>, vector<16x8xbf16> -> vector<16x32xbf16>
    %c0_50 = arith.constant 0 : index
    %c0_51 = arith.constant 0 : index
    %74 = vector.load %arg3[%c0_50, %c0_51] : memref<32x32xbf16, #tpu.memory_space<vmem>>, vector<32x32xbf16>
    %cst_52 = arith.constant dense<0.000000e+00> : vector<16x32xf32>
    %75 = tpu.matmul %73, %74, %cst_52 {dimension_numbers = #tpu.dot_dimension_numbers<[1], [0], [0], [1], [0, 0, 1, 1], [], []>} : vector<16x32xbf16>, vector<32x32xbf16>, vector<16x32xf32> -> vector<16x32xf32>
    %c0_53 = arith.constant 0 : index
    %c0_54 = arith.constant 0 : index
    %76 = vector.load %arg4[%c0_53, %c0_54] : memref<1x32xf32, #tpu.memory_space<vmem>>, vector<1x32xf32>
    %77 = vector.broadcast %76 : vector<1x32xf32> to vector<16x32xf32>
    %78 = arith.addf %75, %77 : vector<16x32xf32>
    %c0_55 = arith.constant 0 : index
    %c0_56 = arith.constant 0 : index
    %c0_57 = arith.constant 0 : index
    %79 = vector.load %arg5[%c0_55, %c0_56, %c0_57] : memref<1x16x32xf32, #tpu.memory_space<vmem>>, vector<1x16x32xf32>
    %80 = vector.shape_cast %79 : vector<1x16x32xf32> to vector<16x32xf32>
    %81 = vector.shape_cast %78 : vector<16x32xf32> to vector<1x16x32xf32>
    tpu.vector_store %arg5[%c0_55, %c0_56, %c0_57], %81 {strides = array<i32>} : memref<1x16x32xf32, #tpu.memory_space<vmem>>, vector<1x16x32xf32>,
    return
  }
  func.func @transform_0(%arg0: i32) -> (i32, i32, i32) {
    %c0_i32 = arith.constant 0 : i32
    %c0_i32_0 = arith.constant 0 : i32
    %c0_i32_1 = arith.constant 0 : i32
    return %arg0, %c0_i32, %c0_i32_0 : i32, i32, i32
  }
  func.func @transform_1(%arg0: i32) -> (i32, i32) {
    %c0_i32 = arith.constant 0 : i32
    %c0_i32_0 = arith.constant 0 : i32
    %c0_i32_1 = arith.constant 0 : i32
    return %c0_i32, %c0_i32_0 : i32, i32
  }
  func.func @transform_2(%arg0: i32) -> (i32, i32) {
    %c0_i32 = arith.constant 0 : i32
    %c0_i32_0 = arith.constant 0 : i32
    %c0_i32_1 = arith.constant 0 : i32
    return %c0_i32, %c0_i32_0 : i32, i32
  }
  func.func @transform_3(%arg0: i32) -> (i32, i32) {
    %c0_i32 = arith.constant 0 : i32
    %c0_i32_0 = arith.constant 0 : i32
    %c0_i32_1 = arith.constant 0 : i32
    return %c0_i32, %c0_i32_0 : i32, i32
  }
  func.func @transform_4(%arg0: i32) -> (i32, i32, i32) {
    %c0_i32 = arith.constant 0 : i32
    %c0_i32_0 = arith.constant 0 : i32
    %c0_i32_1 = arith.constant 0 : i32
    return %arg0, %c0_i32, %c0_i32_0 : i32, i32, i32
  }
}

</mosaic_0001>

<bundles_post_ra>
// kernel: tpu_custom_call.1
= control target key start
LH: loop header
LB: loop body
LE: loop exit
PB: predicated region body
PF: predicated region fallthrough
CT: control target
= control target key end

     0   :  { %9 = vsyncpa [#allocation7], 0  ;;  %s1419_s0 = inlined_call_operand.hbm [shape: bf16[2,16,32], index: 0, kind: input, shape index: {}]   ;;  %s1420_s1 = inlined_call_operand.hbm [shape: bf16[32,96], index: 1, kind: input, shape index: {}]   ;;  %s1421_s2 = inlined_call_operand.hbm [shape: bf16[32,32], index: 2, kind: input, shape index: {}]   ;;  %s1422_s3 = inlined_call_operand.vmem [shape: f32[1,32], index: 3, kind: input, shape index: {}]   ;;  %s1423_s4 = inlined_call_operand.hbm [shape: f32[2,16,32], index: 4, kind: output, shape index: {}]  }
   0x1   :  { %11 = vsyncpa [#allocation7 + $0x1], 0 }
   0x2   :  { %12 = vsyncpa [#allocation10], 0 }
   0x3   :  { %13 = vsyncpa [#allocation8], 0 }
   0x4   :  { %15 = vsyncpa [#allocation8 + $0x1], 0  ;;  %s1114_s15 = smov 0   ;;  %s1116_s16 = smov 0  }
   0x5   :  { %s1118_s17 = smov 0   ;;  %s1120_s18 = smov 0  }
   0x6 LB: > { %s1135_s19 = sadd.s32 4294967295, %s1058_s18   ;;  %s717_s20 = sadd.s32 4294967294, %s1058_s18   ;;  %s1058_s18 = sphi %s1120_s18, %s1443_s18   ;;  %s1054_s17 = sphi %s1118_s17, %s1442_s17   ;;  %s1050_s16 = sphi %s1116_s16, %s1441_s16   ;;  %s1046_s15 = sphi %s1114_s15, %s1440_s15  }
   0x7   : > { %p41_p0 = scmp.ne.s32.totalorder %s1050_s16, %s1046_s15  ;;  %p1424_p1 = scmp.eq.s32.totalorder %s1135_s19, 0 }
   0x8   : > { %p134_p3 = scmp.eq.s32.totalorder %s717_s20, 1  ;;  %p718_p5 = scmp.ge.s32.totalorder %s1058_s18, 1 }
   0x9   : > { %p1144_p4 = por %p1424_p1, %p41_p0  ;;  %p141_p7 = scmp.lt.s32.totalorder %s1058_s18, 3 }
   0xa   : > { %p1149_p6 = por %p134_p3, %p41_p0  ;;  %s1064_s24 = smov [#allocation9]  }
   0xb   : > { %s1427_s21 = scalar_select %p1144_p4, 1, 0 }
   0xc   : > { %s1428_s22 = scalar_select %p1149_p6, 1, 0 }
   0xd   : > { %p1154_p8 = pnand %p718_p5, %p141_p7  ;;  %s153_s25 = sshll.u32 %s1064_s24, 4  ;;  %s1158_s25 = int_to_ptr.vmem [resolvable:$true] %s153_s25 }
   0xe   : > { %s1065_s27 = smov [#allocation11]   ;;  %s898_s5 = scalar_lea.hbm %s1420_s1, 256 }
   0xf   : > { %p801_p9 = pneg %p1154_p8  ;;  %s166_s28 = sshll.u32 %s1065_s27, 4  ;;  %s1169_s28 = int_to_ptr.vmem [resolvable:$true] %s166_s28 }
  0x10   : > { %p899_p12 = scmp.ne.s32.totalorder %s1420_s1, %s898_s5  ;;  %p905_p5 = scmp.lt.u32.totalorder %s898_s5, %s1420_s1 }
  0x11   : > { %p1165_p11 = pnand %p801_p9, %p1424_p1 }
  0x13   : > { %p900_p13 = pneg %p1165_p11 }
  0x15   : > { %p901_p0 = pnand %p900_p13, %p899_p12 }
  0x17   : > { %p902_p3 = pneg %p901_p0 }
  0x19   : > { %p907_p7 = pnand %p905_p5, %p902_p3 }
  0x1b   : > { %910 = shalt.err (!%p907_p7)
}
  0x1c   : > { %s911_s10 = scalar_lea.vmem %s1158_s25, 256  ;;  %p919_p2 = scmp.lt.s32.totalorder %s1158_s25, %s1158_s25 }
  0x1d   : > { %p912_p9 = scmp.ne.s32.totalorder %s1158_s25, %s911_s10  ;;  %p920_p12 = scmp.lt.s32.totalorder %s911_s10, %s911_s10 }
  0x1f   : > { %p914_p10 = pnand %p912_p9, %p900_p13  ;;  %p921_p0 = por %p920_p12, %p919_p2 }
  0x21   : > { %p915_p1 = pneg %p914_p10 }
  0x23   : > { %p922_p6 = pnand %p921_p0, %p915_p1 }
  0x25   : > { %925 = shalt.err (!%p922_p6)
}
  0x26   : > { %s1066_s11 = smov 64   ;;  %s1067_s12 = smov 4  }
  0x27   : > { %804 = dma.hbm_to_vmem [thread:$0]  (!%p1165_p11), %s1420_s1, 256, %s1158_s25, [#allocation10], %s1066_s11, %s1066_s11, %s1067_s12  }
  0x28   : > { %s926_s27 = scalar_lea.hbm %s1421_s2, 256 }
  0x29   : > { %p927_p1 = scmp.ne.s32.totalorder %s1421_s2, %s926_s27  ;;  %p933_p10 = scmp.lt.u32.totalorder %s926_s27, %s1421_s2 }
  0x2b   : > { %p929_p2 = pnand %p927_p1, %p900_p13 }
  0x2d   : > { %p930_p6 = pneg %p929_p2 }
  0x2f   : > { %p935_p3 = pnand %p933_p10, %p930_p6 }
  0x31   : > { %938 = shalt.err (!%p935_p3)
}
  0x32   : > { %s939_s25 = scalar_lea.vmem %s1169_s28, 256  ;;  %p947_p12 = scmp.lt.s32.totalorder %s1169_s28, %s1169_s28 }
  0x33   : > { %p940_p5 = scmp.ne.s32.totalorder %s1169_s28, %s939_s25  ;;  %p948_p0 = scmp.lt.s32.totalorder %s939_s25, %s939_s25 }
  0x35   : > { %p942_p7 = pnand %p940_p5, %p900_p13  ;;  %p949_p1 = por %p948_p0, %p947_p12 }
  0x37   : > { %p943_p9 = pneg %p942_p7 }
  0x39   : > { %p950_p2 = pnand %p949_p1, %p943_p9 }
  0x3b   : > { %953 = shalt.err (!%p950_p2)
}
  0x3c   : > { %807 = dma.hbm_to_vmem [thread:$0]  (!%p1165_p11), %s1421_s2, 256, %s1169_s28, [#allocation10], %s1066_s11, %s1066_s11, %s1067_s12  }
  0x3d   : > { %s1230_s26 = sadd.s32 1, %s1058_s18   ;;  %s28_s9 = sadd.s32 1, %s1054_s17 }
  0x3e   : > { %s25_s10 = ssub.s32 %s1058_s18, %s1230_s26  ;;  %p35_p13 = scmp.ne.s32.totalorder %s1054_s17, %s1050_s16 }
  0x3f   : > { %p26_p6 = scmp.eq.s32.totalorder %s25_s10, 0  ;;  %p36_p10 = scmp.eq.s32.totalorder %s1058_s18, 0 }
  0x40   : > { %p1431_p3 = scmp.eq.s32.totalorder %s1135_s19, 1  ;;  %p818_p7 = scmp.lt.s32.totalorder %s1058_s18, 2 }
  0x41   : > { %s1246_s14 = scalar_select %p26_p6, %s1054_s17, %s28_s9  }
  0x42   : > { %p1240_p5 = por %p1431_p3, %p35_p13  ;;  %p37_p9 = por %p36_p10, %p35_p13 }
  0x43   : > { %s183_s20 = sand.u32 1, %s1054_s17   ;;  %s749_s28 = sshll.u32 %s1058_s18, 7 }
  0x44   : > { %s1432_s13 = scalar_select %p1240_p5, 1, 0 }
  0x45   : > { %s722_s24 = sshll.u32 %s183_s20, 3  ;;  %s1253_s30 = scalar_lea.hbm %s1419_s0, %s749_s28 }
  0x46   : > { %s187_s5 = scalar_lea.vmem [#allocation6], %s722_s24  ;;  %p1257_p11 = pnand %p818_p7, %p37_p9 }
  0x47   : > { %s194_s6 = sshll.u32 %s187_s5, 4  ;;  %s1261_s7 = scalar_lea.sflag [#allocation7], %s183_s20  ;;  %s1255_s6 = int_to_ptr.vmem [resolvable:$true] %s194_s6 }
  0x48   : > { %s954_s8 = scalar_lea.hbm %s1253_s30, 128  ;;  %p956_p0 = pneg %p1257_p11 }
  0x49   : > { %p955_p12 = scmp.ne.s32.totalorder %s1253_s30, %s954_s8  ;;  %s959_s24 = scalar_lea.hbm %s1419_s0, 256 }
  0x4a   : > { %p960_p13 = scmp.lt.u32.totalorder %s1253_s30, %s1419_s0  ;;  %p961_p6 = scmp.lt.u32.totalorder %s959_s24, %s954_s8 }
  0x4b   : > { %p957_p1 = pnand %p956_p0, %p955_p12  ;;  %p963_p3 = scmp.lt.u32.totalorder %s954_s8, %s1253_s30 }
  0x4c   : > { %p962_p10 = por %p961_p6, %p960_p13 }
  0x4d   : > { %p958_p2 = pneg %p957_p1 }
  0x4e   : > { %p964_p7 = por %p963_p3, %p962_p10 }
  0x50   : > { %p965_p9 = pnand %p964_p7, %p958_p2 }
  0x52   : > { %968 = shalt.err (!%p965_p9)
}
  0x53   : > { %s969_s20 = scalar_lea.vmem %s1255_s6, 128  ;;  %s1068_s29 = smov [#allocation6]  }
  0x54   : > { %p970_p12 = scmp.ne.s32.totalorder %s1255_s6, %s969_s20  ;;  %s974_s5 = sshll.u32 %s1068_s29, 4  ;;  %s975_s5 = int_to_ptr.vmem [resolvable:$false] %s974_s5 }
  0x55   : > { %s976_s9 = scalar_lea.vmem %s975_s5, 256  ;;  %p977_p4 = scmp.lt.s32.totalorder %s1255_s6, %s975_s5 }
  0x56   : > { %p972_p1 = pnand %p970_p12, %p956_p0  ;;  %p978_p13 = scmp.lt.s32.totalorder %s976_s9, %s969_s20 }
  0x58   : > { %p973_p5 = pneg %p972_p1  ;;  %p979_p6 = por %p978_p13, %p977_p4 }
  0x5a   : > { %p980_p10 = pnand %p979_p6, %p973_p5 }
  0x5c   : > { %983 = shalt.err (!%p980_p10)
}
  0x5d   : > { %811 = dma.hbm_to_vmem [thread:$0]  (!%p1257_p11), %s1253_s30, 128, %s1255_s6, %s1261_s7, %s1066_s11, %s1066_s11, %s1067_s12  }
  0x5e   : > { %206 = sbr.rel (%p1154_p8) target bundleno = 1431 (0x597), region = 36  ;;  %s1295_s8 = sand.u32 (!%p1154_p8), 1, %s1050_s16  }
  0x5f   : > { %s726_s10 = sshll.u32 (!%p1154_p8), %s1295_s8, 3  ;;  %s209_s24 = scalar_lea.sflag (!%p1154_p8), [#allocation7], %s1295_s8 }
  0x60   : > { %s212_s28 = scalar_lea.vmem (!%p1154_p8), [#allocation6], %s726_s10  ;;  %p1434_p4 = scmp.ne.s32.totalorder (!%p1154_p8), %s1427_s21, 0 }
  0x65   : > { %1033 = dma.done.wait (%p1434_p4), %s209_s24, 128  }
  0x66   : > { %1035 = vsyncadd (%p1434_p4), %s209_s24, 4294967168  ;;  %p1435_p5 = scmp.eq.s32.totalorder %s1135_s19, 0 }
  0x68   : > { %1037 = dma.done.wait (%p1435_p5), [#allocation10], 512   ;;  %p1436_p11 = pmov %p1435_p5 }
  0x69   : > { %s729_s23 = sshll.u32 %s1295_s8, 4  ;;  %v1069_v0 = vmov 0.0   ;;  %vm1070_vm0 = vmmov 0   ;;  %v885_v1 = vld [vmem:[#allocation9] sm:$0xff]   ;;  %v886_v2 = vld [vmem:[#allocation9 + $0x8] sm:$0xff]   ;;  %v887_v3 = vld [vmem:[%s212_s28] sm:$0xff]  }
  0x6a   : > { %1039 = vsyncadd (%p1436_p11), [#allocation10], 4294966784  ;;  %761 = vmatprep.subr.bf16.mxu0 %v1069_v0  ;;  %765 = vmatprep.mubr.msk.bf16.mxu0 %vm1070_vm0, %v1069_v0  ;;  %vm269_vm1 = vcmask 261120   ;;  %vm315_vm2 = vcmask 64512   ;;  %s1071_s21 = smov 120   ;;  %s1072_s11 = smov 96  }
  0x6b   : > { %762 = vmatpush3.bf16.msra.mxu0 %v885_v1  ;;  %s1073_s12 = smov 88   ;;  %s1074_s30 = smov 64  }
  0x6c   : > { %763 = vmatprep.subr.bf16.mxu0 %v1069_v0  ;;  %s1075_s6 = smov 112   ;;  %s1076_s25 = smov 56  }
  0x6d   : > { %s1077_s7 = smov 48   ;;  %s1078_s27 = smov 80  }
  0x6e   : > { %s1079_s20 = smov 72   ;;  %s1080_s29 = smov 104  }
  0x6f   : > { %764 = vmatpush3.bf16.msra.mxu0 %v886_v2  ;;  %s1081_s5 = smov 40   ;;  %s1327_s9 = scalar_lea.vmem [#allocation12], %s729_s23 }
  0x70   : > { %s1329_s10 = smov 0  }
  0x72   : > { %766 = vmatmul.mubr.msk.bf16.vlgmr.msra.gmra.mrb[0].mxu0 %vm269_vm1, %v887_v3 }
 0x145   : > { %v307_v4 = vpop.f32.mrb[0].mxu0 }
 0x146   : > { %v767_v5 = vpop.f32.mrb[1].mxu0 }
 0x147   : > { %v310_v6 = vpop.f32.mrb[2].mxu0 }
 0x148   : > { %v314_v7 = vpack.c.bf16 %v310_v6, %v307_v4  ;;  %v768_v8 = vpop.f32.mrb[3].mxu0 }
 0x14a   : > { %326 = vrot.lane.b32.xlu1 %v314_v7, %s1071_s21  ;;  %318 = vrot.lane.b32.xlu0 %v314_v7, %s1072_s11  ;;  %316 = vst.msk [vmem:[#allocation2] sm:$0xff] %vm315_vm2, %v314_v7 }
 0x14e   : > { %331 = vrot.lane.b32.xlu1 %v314_v7, %s1073_s12  ;;  %322 = vrot.lane.b32.xlu0 %v314_v7, %s1074_s30 }
 0x152   : > { %341 = vrot.lane.b32.xlu1 %v314_v7, %s1075_s6  ;;  %336 = vrot.lane.b32.xlu0 %v314_v7, %s1076_s25 }
 0x156   : > { %351 = vrot.lane.b32.xlu1 %v314_v7, %s1077_s7  ;;  %346 = vrot.lane.b32.xlu0 %v314_v7, %s1078_s27 }
 0x15a   : > { %361 = vrot.lane.b32.xlu1 %v314_v7, %s1079_s20  ;;  %356 = vrot.lane.b32.xlu0 %v314_v7, %s1080_s29 }
 0x15e   : > { %366 = vrot.lane.b32.xlu0 %v314_v7, %s1081_s5 }
 0x1bc   : > { %v327_v9 = vpop.permute.xlu1 %326  ;;  %v319_v10 = vpop.permute.xlu0 %318 }
 0x1bd   : > { %330 = vst.msk [vmem:[#allocation2 + $0x8] sm:$0xff] %vm315_vm2, %v327_v9  ;;  %321 = vst.msk [vmem:[#allocation3] sm:$0xff] %vm315_vm2, %v319_v10 }
 0x1c0   : > { %v332_v11 = vpop.permute.xlu1 %331  ;;  %v323_v12 = vpop.permute.xlu0 %322 }
 0x1c1   : > { %335 = vst.msk [vmem:[#allocation3 + $0x8] sm:$0xff] %vm315_vm2, %v332_v11  ;;  %325 = vst.msk [vmem:[#allocation4] sm:$0xff] %vm315_vm2, %v323_v12 }
 0x1c4   : > { %v342_v13 = vpop.permute.xlu1 %341  ;;  %v337_v14 = vpop.permute.xlu0 %336 }
 0x1c5   : > { %345 = vst.msk [vmem:[#allocation2 + $0x10] sm:$0xff] %vm315_vm2, %v342_v13  ;;  %340 = vst.msk [vmem:[#allocation4 + $0x8] sm:$0xff] %vm315_vm2, %v337_v14 }
 0x1c8   : > { %v352_v15 = vpop.permute.xlu1 %351  ;;  %v347_v16 = vpop.permute.xlu0 %346 }
 0x1c9   : > { %355 = vst.msk [vmem:[#allocation4 + $0x10] sm:$0xff] %vm315_vm2, %v352_v15  ;;  %350 = vst.msk [vmem:[#allocation3 + $0x10] sm:$0xff] %vm315_vm2, %v347_v16 }
 0x1cc   : > { %v362_v17 = vpop.permute.xlu1 %361  ;;  %v357_v18 = vpop.permute.xlu0 %356 }
 0x1cd   : > { %365 = vst.msk [vmem:[#allocation3 + $0x18] sm:$0xff] %vm315_vm2, %v362_v17  ;;  %360 = vst.msk [vmem:[#allocation2 + $0x18] sm:$0xff] %vm315_vm2, %v357_v18 }
 0x1d0   : > { %v367_v19 = vpop.permute.xlu0 %366 }
 0x1d1   : > { %370 = vst.msk [vmem:[#allocation4 + $0x18] sm:$0xff] %vm315_vm2, %v367_v19 }
 0x1d2 LB: >> { %v1082_v20 = vmov 0.0   ;;  %vm1083_vm3 = vmmov 0   ;;  %s1335_s24 = sshll.u32 %s1062_s10, 3  ;;  %vm433_vm4 = vcmask 130048   ;;  %s376_s10 = sadd.s32 1, %s1062_s10   ;;  %s1062_s10 = sphi %s1329_s10, %s376_s10  }
 0x1d3   : >> { %769 = vmatprep.subr.bf16.mxu0 %v1082_v20  ;;  %771 = vmatprep.mubr.msk.bf16.mxu0 %vm1083_vm3, %v1082_v20  ;;  %s381_s28 = scalar_lea.vmem [#allocation3], %s1335_s24  ;;  %s378_s23 = scalar_lea.vmem [#allocation2], %s1335_s24 }
 0x1d4   : >> { %775 = vmatprep.subr.bf16.mxu1 %v1082_v20  ;;  %777 = vmatprep.mubr.msk.bf16.mxu1 %vm1083_vm3, %v1082_v20  ;;  %v382_v21 = vld [vmem:[%s381_s28] sm:$0xff]  ;;  %s384_s21 = scalar_lea.vmem [#allocation4], %s1335_s24  ;;  %s503_s11 = scalar_lea.vmem [#allocation5], %s1335_s24 }
 0x1d5   : >> { %v390_v22 = vsel %vm315_vm2, %v382_v21, 0  ;;  %v379_v23 = vld [vmem:[%s378_s23] sm:$0xff]  ;;  %p373_p8 = scmp.ge.s32.totalorder %s376_s10, 4  }
 0x1d6   : >> { %770 = vmatpush3.bf16.xpose.msra.mxu0 %v390_v22  ;;  %s1084_s12 = smov (%p373_p8), 8   ;;  %v896_v55 = vld [vmem:[#allocation11] sm:$0xff] (%p373_p8)   ;;  %s1085_s30 = smov (%p373_p8), 24   ;;  %v897_v57 = vld [vmem:[#allocation11 + $0x8] sm:$0xff] (%p373_p8)   ;;  %vm527_vm5 = vcmask (%p373_p8), 195584  }
 0x1d7   : > { %781 = vmatprep.subr.bf16.mxu0 (%p373_p8), %v1069_v0  ;;  %s1086_s6 = smov (%p373_p8), 16   ;;  %s750_s27 = sshll.u32 (%p373_p8), %s1135_s19, 8 }
 0x1d8   : >> { %v385_v30 = vld [vmem:[%s384_s21] sm:$0xff]  ;;  %s612_s20 = sshll.u32 (%p373_p8), %s1327_s9, 4  ;;  %s1368_s10 = scalar_lea.hbm (%p373_p8), %s1423_s4, %s750_s27  ;;  %s1372_s20 = int_to_ptr.vmem [resolvable:$true] %s612_s20 }
 0x1d9   : >> { %776 = vmatpush3.bf16.msra.mxu1 %v385_v30  ;;  %s599_s19 = scalar_lea.sflag (%p373_p8), [#allocation8], %s1295_s8  ;;  %s984_s24 = scalar_lea.vmem (%p373_p8), %s1372_s20, 256 }
 0x1da   : > { %p985_p0 = scmp.ne.s32.totalorder (%p373_p8), %s1372_s20, %s984_s24  ;;  %p1437_p2 = scmp.ne.s32.totalorder (%p373_p8), %s1432_s13, 0 }
 0x1db   : > { %s1087_s28 = smov (%p373_p8), [#allocation12]  }
 0x1dc   : > { %p986_p3 = pnand (%p373_p8), %p985_p0, %p1437_p2  ;;  %s988_s23 = sshll.u32 (%p373_p8), %s1087_s28, 4  ;;  %s989_s23 = int_to_ptr.vmem [resolvable:$false] %s988_s23 }
 0x1dd   : >> { %772 = vmatmul.mubr.msk.bf16.vlgmr.msra.gmra.mrb[0].mxu0 %vm315_vm2, %v379_v23  ;;  %s990_s21 = scalar_lea.vmem (%p373_p8), %s989_s23, 512  ;;  %p991_p9 = scmp.lt.s32.totalorder (%p373_p8), %s1372_s20, %s989_s23 }
 0x1de   : > { %785 = vmatprep.mubr.msk.bf16.mxu0 (%p373_p8), %vm1070_vm0, %v1069_v0  ;;  %782 = vmatpush3.bf16.msra.mxu0 (%p373_p8), %v896_v55  ;;  %p987_p7 = pneg (%p373_p8), %p986_p3  ;;  %p992_p12 = scmp.lt.s32.totalorder (%p373_p8), %s990_s21, %s984_s24 }
 0x1df   : > { %783 = vmatprep.subr.bf16.mxu0 (%p373_p8), %v1069_v0  ;;  %v740_v0 = vld [vmem:[%s1422_s3] ss:$0 sm:$0xff] (%p373_p8) }
 0x1e0   : > { %p993_p1 = por (%p373_p8), %p992_p12, %p991_p9 }
 0x1e2   : > { %784 = vmatpush3.bf16.msra.mxu0 (%p373_p8), %v897_v57  ;;  %p994_p13 = pnand (%p373_p8), %p993_p1, %p987_p7 }
 0x2b0   : >> { %v426_v24 = vpop.f32.mrb[0].mxu0 }
 0x2b1   : >> { %v773_v25 = vpop.f32.mrb[1].mxu0  ;;  %v434_v26 = vsel %vm433_vm4, %v426_v24, -inf }
 0x2b2   : >> { %435 = vmax.xlane.f32.xlu0 %v434_v26  ;;  %v429_v27 = vpop.f32.mrb[2].mxu0 }
 0x2b3   : >> { %v774_v28 = vpop.f32.mrb[3].mxu0  ;;  %v437_v29 = vsel %vm433_vm4, %v429_v27, -inf }
 0x2b6   : >> { %438 = vmax.xlane.f32.xlu0 %v437_v29 }
 0x33f   : >> { %v436_v31 = vpop.xlane.xlu0 %435 }
 0x340   : >> { %v440_v32 = vsub.f32 %v426_v24, %v436_v31 }
 0x342   : >> { %v442_v33 = vmul.f32 1.442695, %v440_v32 }
 0x343   : >> { %v439_v34 = vpop.xlane.xlu0 %438 }
 0x344   : >> { %888 = vpow2.f32 %v442_v33  ;;  %v441_v35 = vsub.f32 %v429_v27, %v439_v34 }
 0x346   : >> { %v444_v36 = vmul.f32 1.442695, %v441_v35 }
 0x348   : >> { %890 = vpow2.f32 %v444_v36 }
 0x34e   : >> { %v889_v37 = vpop.eup %888 }
 0x34f   : >> { %v446_v38 = vsel %vm433_vm4, %v889_v37, 0.0 }
 0x350   : >> { %447 = vadd.xlane.f32.xlu1 %v446_v38 }
 0x352   : >> { %v891_v39 = vpop.eup %890 }
 0x353   : >> { %v449_v40 = vsel %vm433_vm4, %v891_v39, 0.0  ;;  %v452_v41 = vpack.c.bf16 %v891_v39, %v889_v37 }
 0x354   : >> { %450 = vadd.xlane.f32.xlu1 %v449_v40 }
 0x355   : >> { %778 = vmatmul.mubr.msk.bf16.vlgmr.msra.gmra.mrb[0].mxu1 %vm433_vm4, %v452_v41 }
 0x3dd   : >> { %v448_v42 = vpop.xlane.xlu1 %447 }
 0x3de   : >> { %892 = vrcp.f32 %v448_v42 }
 0x3e1   : >> { %v451_v43 = vpop.xlane.xlu1 %450 }
 0x3e2   : >> { %894 = vrcp.f32 %v451_v43 }
 0x3e8   : >> { %v893_v45 = vpop.eup %892 }
 0x3ec   : >> { %v895_v47 = vpop.eup %894 }
 0x428   : >> { %v490_v44 = vpop.f32.mrb[0].mxu1 }
 0x429   : >> { %v779_v46 = vpop.f32.mrb[1].mxu1  ;;  %v499_v49 = vmul.f32 %v893_v45, %v490_v44  ;;  %375 = sbr.rel (!%p373_p8) target bundleno = 466 (0x1d2), region = 112 }
 0x42a   : >> { %v493_v48 = vpop.f32.mrb[2].mxu1 }
 0x42b   : >> { %v500_v50 = vmul.f32 %v895_v47, %v493_v48  ;;  %v780_v51 = vpop.f32.mrb[3].mxu1 }
 0x42d   : >> { %v501_v52 = vpack.c.bf16 %v500_v50, %v499_v49 }
 0x42f   : >> { %504 = vst.msk [vmem:[%s503_s11] sm:$0xff] %vm315_vm2, %v501_v52 }
 0x436   : > { %v507_v53 = vld [vmem:[#allocation5 + $0x8] sm:$0xff]  ;;  %v511_v54 = vld [vmem:[#allocation5 + $0x18] sm:$0xff]  ;;  %v509_v56 = vld [vmem:[#allocation5 + $0x10] sm:$0xff] }
 0x437   : > { %513 = vrot.lane.b32.xlu0 %v507_v53, %s1084_s12  ;;  %519 = vrot.lane.b32.xlu1 %v511_v54, %s1085_s30  ;;  %v505_v59 = vld [vmem:[#allocation5] sm:$0xff] }
 0x43b   : > { %516 = vrot.lane.b32.xlu0 %v509_v56, %s1086_s6 }
 0x4a9   : > { %v514_v58 = vpop.permute.xlu0 %513  ;;  %v520_v60 = vpop.permute.xlu1 %519 }
 0x4aa   : > { %v523_v61 = vsel %vm315_vm2, %v505_v59, %v514_v58 }
 0x4ad   : > { %v517_v62 = vpop.permute.xlu0 %516 }
 0x4ae   : > { %v526_v63 = vsel %vm433_vm4, %v523_v61, %v517_v62 }
 0x4af   : > { %v529_v1 = vsel %vm527_vm5, %v526_v63, %v520_v60 }
 0x4b0   : > { %786 = vmatmul.mubr.msk.bf16.vlgmr.msra.gmra.mrb[0].mxu0 %vm269_vm1, %v529_v1 }
 0x583   : > { %v589_v2 = vpop.f32.mrb[0].mxu0 }
 0x584   : > { %v590_v3 = vadd.f32 %v740_v0, %v589_v2  ;;  %v787_v4 = vpop.f32.mrb[1].mxu0 }
 0x585   : > { %v592_v5 = vpop.f32.mrb[2].mxu0 }
 0x586   : > { %596 = vst.msk [vmem:[%s1327_s9] sm:$0xff] %vm269_vm1, %v590_v3  ;;  %v593_v6 = vadd.f32 %v740_v0, %v592_v5  ;;  %v788_v7 = vpop.f32.mrb[3].mxu0 }
 0x588   : > { %597 = vst.msk [vmem:[%s1327_s9 + $0x8] sm:$0xff] %vm269_vm1, %v593_v6 }
 0x589   : > { %997 = shalt.err (!%p994_p13)
}
 0x58a   : > { %s998_s9 = scalar_lea.hbm %s1368_s10, 256  ;;  %s1002_s6 = scalar_lea.hbm %s1423_s4, 512 }
 0x58b   : > { %p999_p6 = scmp.ne.s32.totalorder %s1368_s10, %s998_s9  ;;  %p1003_p5 = scmp.lt.u32.totalorder %s1368_s10, %s1423_s4 }
 0x58c   : > { %p1004_p11 = scmp.lt.u32.totalorder %s1002_s6, %s998_s9  ;;  %p1006_p0 = scmp.lt.u32.totalorder %s998_s9, %s1368_s10 }
 0x58d   : > { %p1000_p10 = pnand %p999_p6, %p1437_p2 }
 0x58e   : > { %p1005_p8 = por %p1004_p11, %p1003_p5 }
 0x58f   : > { %p1001_p4 = pneg %p1000_p10 }
 0x590   : > { %p1007_p3 = por %p1006_p0, %p1005_p8 }
 0x592   : > { %p1008_p7 = pnand %p1007_p3, %p1001_p4 }
 0x594   : > { %1011 = shalt.err (!%p1008_p7)
}
 0x595   : > { %s1088_s27 = smov 128  }
 0x596   : > { %799 = dma.vmem_to_hbm [thread:$0]  (%p1437_p2), %s1372_s20, 256, %s1368_s10, %s599_s19, %s1088_s27, %s1088_s27, %s1084_s12  }
 0x597 PF: > { %s627_s29 = sand.u32 1, %s1046_s15   ;;  %p1438_p9 = scmp.ne.s32.totalorder %s1428_s22, 0 }
 0x598   : > { %p1439_p12 = scmp.ge.s32.totalorder %s1058_s18, 2  ;;  %s628_s5 = scalar_lea.sflag [#allocation8], %s627_s29 }
 0x59a   : > { %p813_p1 = pnand %p1439_p12, %p1438_p9 }
 0x59c   : > { %1041 = dma.done.wait (!%p813_p1), %s628_s5, 256  }
 0x59d   : > { %1043 = vsyncadd (!%p813_p1), %s628_s5, 4294967040  ;;  %p18_p13 = scmp.ge.s32.totalorder %s1230_s26, 4   ;;  %s1440_s15 = smov %s1050_s16 }
 0x59e   : > { %s1441_s16 = smov %s1054_s17  ;;  %s1442_s17 = smov %s1246_s14 }
 0x59f   : > { %s1443_s18 = smov %s1230_s26  ;;  %20 = sbr.rel (!%p18_p13) target bundleno = 6 (0x6), region = 123 }
 0x5a6   :  { %633 = vsyncpa [#allocation7], 1 }
 0x5a7   :  { %635 = vsyncpa [#allocation7 + $0x1], 1 }
 0x5a8   :  { %636 = vsyncpa [#allocation10], 1 }
 0x5a9   :  { %637 = vsyncpa [#allocation8], 1 }
 0x5aa   :  { %639 = vsyncpa [#allocation8 + $0x1], 1 }

</bundles_post_ra>
